<compile_context>
chip_gen: v5e
topology: v5e:2x2
jax: 0.10.0
libtpu: 0.0.40
codegen_flags: <defaults>
</compile_context>

<pallas_src>
import functools

import jax
import jax.numpy as jnp
import numpy as np
from jax.experimental import pallas as pl
from jax.experimental.pallas import tpu as pltpu


def _convt_act_kernel(w_ref, b_ref, xc_ref, xn_ref, o_ref, xb_ref, *, H, W, T):
    # w_ref : (4, 4*Cout, Cin)  one (4*Cout, Cin) weight per tap shift
    # b_ref : (4*Cout, 1)       bias replicated per parity block
    # xc_ref: (Cin, T)          current column tile of the flattened input
    # xn_ref: (Cin, T)          next tile (clamped) -> halo source
    # o_ref : (4*Cout, T)       parity/channel-major output tile
    # xb_ref: (Cin, T + W + 1)  VMEM staging buffer: tile ++ halo
    cin = xc_ref.shape[0]

    x00 = xc_ref[...]                                   # x[i, j]
    xb_ref[:, :T] = x00
    halo = min(W + 1, T)
    xb_ref[:, T:T + halo] = xn_ref[:, :halo]
    if halo < W + 1:                                    # static branch (k == 1 tiles)
        xb_ref[:, T + halo:] = jnp.zeros((cin, W + 1 - halo), jnp.float32)

    # All shifted taps are plain static slices of the contiguous staging buffer.
    x01 = xb_ref[:, 1:T + 1]                            # x[i,   j+1]
    x10 = xb_ref[:, W:T + W]                            # x[i+1, j  ]
    x11 = xb_ref[:, W + 1:T + W + 1]                    # x[i+1, j+1]

    lane = jax.lax.broadcasted_iota(jnp.int32, (1, T), 1)
    col = pl.program_id(0) * T + lane                   # global flattened column
    mask_j = (lane % W) != (W - 1)                      # j+1 still inside the image?
    mask_i = col < (H - 1) * W                          # i+1 still inside the image?

    x01 = jnp.where(mask_j, x01, 0.0)
    x10 = jnp.where(mask_i, x10, 0.0)
    x11 = jnp.where(mask_j & mask_i, x11, 0.0)

    y = jnp.dot(w_ref[0], x00, preferred_element_type=jnp.float32)
    y = y + jnp.dot(w_ref[1], x01, preferred_element_type=jnp.float32)
    y = y + jnp.dot(w_ref[2], x10, preferred_element_type=jnp.float32)
    y = y + jnp.dot(w_ref[3], x11, preferred_element_type=jnp.float32)
    y = y + b_ref[...]

    v = jnp.tanh(y)
    v = jnp.maximum(v, 0.0)                              # relu (second ReLU is a no-op)
    o_ref[...] = jnp.tanh(v)


def _pick_tile(H, W):
    """Column tile over the flattened H*W axis: k*W (k | H), multiple of 128,
    preferring <=1024 lanes and >=2 grid steps; falls back to one full block."""
    HW = H * W
    cands = []
    for k in range(1, H + 1):
        if H % k == 0:
            T = k * W
            if T % 128 == 0 and T < HW:          # < HW  =>  at least 2 grid steps
                cands.append(T)
    if not cands:
        return HW                                # tiny / non-factorable shapes
    small = [t for t in cands if t <= 1024]
    return max(small) if small else min(cands)


def _invariant_spec(shape):
    """Grid-invariant operand: constant index_map, single-buffered if supported."""
    imap = lambda t: (0,) * len(shape)
    try:
        return pl.BlockSpec(shape, imap, pipeline_mode=pl.Buffered(1))
    except Exception:
        return pl.BlockSpec(shape, imap)


@jax.jit
def model_forward(x_nchw, weight, bias):
    """x_nchw: (1, Cin, H, W); weight: (Cin, Cout, 3, 3) PyTorch ConvTranspose2d; bias: (Cout,)."""
    N, Cin, H, W = x_nchw.shape
    assert N == 1, "kernel handles batch=1 (as in the reference module)"
    assert H >= 2 and W >= 2
    Cout = weight.shape[1]
    HW = H * W
    f32 = jnp.float32

    # ---- block weights: one (4*Cout, Cin) matrix per input tap shift --------
    # Parity decomposition of ConvTranspose2d (s=2, p=1, op=1, k=3), output
    # rows ordered (ee, eo, oe, oo):
    #   y[2i  ,2j  ] = w11 x[i,j]
    #   y[2i  ,2j+1] = w12 x[i,j] + w10 x[i,j+1]
    #   y[2i+1,2j  ] = w21 x[i,j] + w01 x[i+1,j]
    #   y[2i+1,2j+1] = w22 x[i,j] + w20 x[i,j+1] + w02 x[i+1,j] + w00 x[i+1,j+1]
    def tap(kh, kw):
        return weight[:, :, kh, kw].T.astype(f32)          # (Cout, Cin)

    Z = jnp.zeros((Cout, Cin), f32)
    w_stack = jnp.stack([
        jnp.concatenate([tap(1, 1), tap(1, 2), tap(2, 1), tap(2, 2)], axis=0),  # * x[i,  j  ]
        jnp.concatenate([Z,         tap(1, 0), Z,         tap(2, 0)], axis=0),  # * x[i,  j+1]
        jnp.concatenate([Z,         Z,         tap(0, 1), tap(0, 2)], axis=0),  # * x[i+1,j  ]
        jnp.concatenate([Z,         Z,         Z,         tap(0, 0)], axis=0),  # * x[i+1,j+1]
    ], axis=0)                                              # (4, 4*Cout, Cin)
    b_block = jnp.tile(bias.astype(f32), 4).reshape(4 * Cout, 1)

    # ---- flattened channel-major input: a free view, NOT duplicated ---------
    x2 = x_nchw.reshape(Cin, HW).astype(f32)

    T = _pick_tile(H, W)
    nT = HW // T
    grid = (nT,)

    kernel = functools.partial(_convt_act_kernel, H=H, W=W, T=T)

    out = pl.pallas_call(
        kernel,
        out_shape=jax.ShapeDtypeStruct((4 * Cout, HW), f32),
        grid=grid,
        in_specs=[
            _invariant_spec((4, 4 * Cout, Cin)),
            _invariant_spec((4 * Cout, 1)),
            pl.BlockSpec((Cin, T), lambda t: (0, t)),
            pl.BlockSpec((Cin, T), lambda t: (0, jnp.minimum(t + 1, nT - 1))),
        ],
        out_specs=pl.BlockSpec((4 * Cout, T), lambda t: (0, t)),
        scratch_shapes=[pltpu.VMEM((Cin, T + W + 1), f32)],
        compiler_params=pltpu.CompilerParams(
            dimension_semantics=("parallel",)),
    )(w_stack, b_block, x2, x2)

    # ---- parity interleave back to torch.flatten(NCHW) order ----------------
    # TODO(synk): fold this column-parity interleave into the kernel store.
    y = out.reshape(2, 2, Cout, H, W)            # (rp, cp, c, i, j)
    y = jnp.transpose(y, (2, 3, 0, 4, 1))        # (c, i, rp, j, cp)
    return y.reshape(-1)                         # == torch.flatten(NCHW output)


def _reference(x_nchw, weight, bias):
    # ConvTranspose2d == lhs-dilated conv with flipped / transposed kernel.
    w_flip = weight[:, :, ::-1, ::-1]                    # (Cin, Cout, 3, 3)
    w_conv = jnp.transpose(w_flip, (1, 0, 2, 3))         # (Cout, Cin, 3, 3)
    y = jax.lax.conv_general_dilated(
        x_nchw, w_conv, window_strides=(1, 1),
        padding=((1, 2), (1, 2)), lhs_dilation=(2, 2),
        dimension_numbers=("NCHW", "OIHW", "NCHW"),
        precision=jax.lax.Precision.HIGHEST)
    y = y + bias.reshape(1, -1, 1, 1)
    v = jnp.tanh(y.reshape(-1))
    v = jnp.maximum(v, 0.0)
    v = jnp.maximum(v, 0.0)
    return jnp.tanh(v)


if __name__ == "__main__":
    key = jax.random.PRNGKey(0)
    k1, k2, k3 = jax.random.split(key, 3)

    # Channels are fixed at 16 by the module's __init__.
    C = 16
    fan_in = C * 3 * 3
    bound = 1.0 / (fan_in ** 0.5)
    weight = jax.random.uniform(k2, (C, C, 3, 3), jnp.float32, -bound, bound)
    bias = jax.random.uniform(k3, (C,), jnp.float32, -bound, bound)

    # Small shape (exercises the multi-tile + halo path) and the module's
    # native 64x64 shape.
    for (H, W) in ((16, 16), (64, 64)):
        x = jax.random.normal(jax.random.fold_in(k1, H), (1, C, H, W), jnp.float32)
        out = jax.block_until_ready(model_forward(x, weight, bias))
        assert out.shape == (C * (2 * H) * (2 * W),)
        ref = _reference(x, weight, bias)
        np.testing.assert_allclose(np.asarray(out), np.asarray(ref),
                                   atol=1e-5, rtol=1e-5)

    print("KERNEL_OK")
</pallas_src>

<mosaic_0001>
module attributes {stable_mosaic.version = 11 : i64} {
  func.func @_convt_act_kernel(%arg0: i32, %arg1: memref<4x64x16xf32, #tpu.memory_space<vmem>>, %arg2: memref<64x1xf32, #tpu.memory_space<vmem>>, %arg3: memref<16x128xf32, #tpu.memory_space<vmem>>, %arg4: memref<16x128xf32, #tpu.memory_space<vmem>>, %arg5: memref<64x128xf32, #tpu.memory_space<vmem>>, %arg6: memref<16x145xf32, #tpu.memory_space<vmem>>) attributes {dimension_semantics = [#tpu.dimension_semantics<parallel>], iteration_bounds = array<i64: 2>, scalar_prefetch = 0 : i64, scratch_operands = 1 : i64, tpu.core_type = #tpu.core_type<tc>, window_params = [{pipeline_mode = #tpu.pipeline_mode<synchronous>, transform_indices = @transform_0, window_bounds = array<i64: 4, 64, 16>}, {pipeline_mode = #tpu.pipeline_mode<synchronous>, transform_indices = @transform_1, window_bounds = array<i64: 64, 1>}, {transform_indices = @transform_2, window_bounds = array<i64: 16, 128>}, {transform_indices = @transform_3, window_bounds = array<i64: 16, 128>}, {transform_indices = @transform_4, window_bounds = array<i64: 64, 128>}]} {
    %c0 = arith.constant 0 : index
    %c0_0 = arith.constant 0 : index
    %0 = vector.load %arg3[%c0, %c0_0] : memref<16x128xf32, #tpu.memory_space<vmem>>, vector<16x128xf32>
    %c0_1 = arith.constant 0 : index
    %c0_2 = arith.constant 0 : index
    %1 = vector.load %arg6[%c0_1, %c0_2] : memref<16x145xf32, #tpu.memory_space<vmem>>, vector<16x128xf32>
    tpu.vector_store %arg6[%c0_1, %c0_2], %0 {strides = array<i32>} : memref<16x145xf32, #tpu.memory_space<vmem>>, vector<16x128xf32>,
    %c0_3 = arith.constant 0 : index
    %c0_4 = arith.constant 0 : index
    %2 = vector.load %arg4[%c0_3, %c0_4] : memref<16x128xf32, #tpu.memory_space<vmem>>, vector<16x17xf32>
    %c0_5 = arith.constant 0 : index
    %c128 = arith.constant 128 : index
    %3 = vector.load %arg6[%c0_5, %c128] : memref<16x145xf32, #tpu.memory_space<vmem>>, vector<16x17xf32>
    tpu.vector_store %arg6[%c0_5, %c128], %2 {strides = array<i32>} : memref<16x145xf32, #tpu.memory_space<vmem>>, vector<16x17xf32>,
    %c0_6 = arith.constant 0 : index
    %c1 = arith.constant 1 : index
    %4 = vector.load %arg6[%c0_6, %c1] : memref<16x145xf32, #tpu.memory_space<vmem>>, vector<16x128xf32>
    %c0_7 = arith.constant 0 : index
    %c16 = arith.constant 16 : index
    %5 = vector.load %arg6[%c0_7, %c16] : memref<16x145xf32, #tpu.memory_space<vmem>>, vector<16x128xf32>
    %c0_8 = arith.constant 0 : index
    %c17 = arith.constant 17 : index
    %6 = vector.load %arg6[%c0_8, %c17] : memref<16x145xf32, #tpu.memory_space<vmem>>, vector<16x128xf32>
    %7 = tpu.iota {dimensions = array<i32: 1>} : vector<1x128xi32>
    %c128_i32 = arith.constant 128 : i32
    %8 = arith.muli %arg0, %c128_i32 : i32
    %9 = vector.broadcast %8 : i32 to vector<1x128xi32>
    %10 = arith.addi %9, %7 : vector<1x128xi32>
    %c16_i32 = arith.constant 16 : i32
    %c0_i32 = arith.constant 0 : i32
    %11 = arith.cmpi eq, %c16_i32, %c0_i32 : i32
    %c1_i32 = arith.constant 1 : i32
    %12 = arith.select %11, %c1_i32, %c16_i32 : i32
    %13 = vector.broadcast %12 : i32 to vector<1x128xi32>
    %14 = arith.remsi %7, %13 : vector<1x128xi32>
    %c0_i32_9 = arith.constant 0 : i32
    %15 = vector.broadcast %c0_i32_9 : i32 to vector<1x128xi32>
    %16 = arith.cmpi ne, %14, %15 : vector<1x128xi32>
    %c0_i32_10 = arith.constant 0 : i32
    %17 = vector.broadcast %c0_i32_10 : i32 to vector<1x128xi32>
    %18 = arith.cmpi slt, %14, %17 : vector<1x128xi32>
    %c0_i32_11 = arith.constant 0 : i32
    %19 = arith.cmpi slt, %12, %c0_i32_11 : i32
    %20 = vector.broadcast %19 : i1 to vector<1x128xi1>
    %21 = vector.broadcast %20 : vector<1x128xi1> to vector<1x128xi1>
    %22 = arith.xori %18, %21 : vector<1x128xi1>
    %23 = arith.andi %22, %16 : vector<1x128xi1>
    %24 = vector.broadcast %12 : i32 to vector<1x128xi32>
    %25 = arith.addi %14, %24 : vector<1x128xi32>
    %26 = arith.select %23, %25, %14 : vector<1x128xi1>, vector<1x128xi32>
    %c15_i32 = arith.constant 15 : i32
    %27 = vector.broadcast %c15_i32 : i32 to vector<1x128xi32>
    %28 = arith.cmpi ne, %26, %27 : vector<1x128xi32>
    %c240_i32 = arith.constant 240 : i32
    %29 = vector.broadcast %c240_i32 : i32 to vector<1x128xi32>
    %30 = arith.cmpi slt, %10, %29 : vector<1x128xi32>
    %cst = arith.constant 0.000000e+00 : f32
    %31 = vector.shape_cast %28 : vector<1x128xi1> to vector<1x128xi1>
    %32 = vector.broadcast %31 : vector<1x128xi1> to vector<16x128xi1>
    %33 = vector.broadcast %cst : f32 to vector<16x128xf32>
    %34 = arith.select %32, %4, %33 : vector<16x128xi1>, vector<16x128xf32>
    %cst_12 = arith.constant 0.000000e+00 : f32
    %35 = vector.shape_cast %30 : vector<1x128xi1> to vector<1x128xi1>
    %36 = vector.broadcast %35 : vector<1x128xi1> to vector<16x128xi1>
    %37 = vector.broadcast %cst_12 : f32 to vector<16x128xf32>
    %38 = arith.select %36, %5, %37 : vector<16x128xi1>, vector<16x128xf32>
    %39 = arith.andi %28, %30 : vector<1x128xi1>
    %cst_13 = arith.constant 0.000000e+00 : f32
    %40 = vector.shape_cast %39 : vector<1x128xi1> to vector<1x128xi1>
    %41 = vector.broadcast %40 : vector<1x128xi1> to vector<16x128xi1>
    %42 = vector.broadcast %cst_13 : f32 to vector<16x128xf32>
    %43 = arith.select %41, %6, %42 : vector<16x128xi1>, vector<16x128xf32>
    %c0_14 = arith.constant 0 : index
    %c0_15 = arith.constant 0 : index
    %c0_16 = arith.constant 0 : index
    %44 = vector.load %arg1[%c0_14, %c0_15, %c0_16] : memref<4x64x16xf32, #tpu.memory_space<vmem>>, vector<1x64x16xf32>
    %45 = vector.shape_cast %44 : vector<1x64x16xf32> to vector<64x16xf32>
    %cst_17 = arith.constant dense<0.000000e+00> : vector<64x128xf32>
    %46 = tpu.matmul %45, %0, %cst_17 {dimension_numbers = #tpu.dot_dimension_numbers<[1], [0], [0], [1], [0, 0, 1, 1], [], []>} : vector<64x16xf32>, vector<16x128xf32>, vector<64x128xf32> -> vector<64x128xf32>
    %c1_18 = arith.constant 1 : index
    %c0_19 = arith.constant 0 : index
    %c0_20 = arith.constant 0 : index
    %47 = vector.load %arg1[%c1_18, %c0_19, %c0_20] : memref<4x64x16xf32, #tpu.memory_space<vmem>>, vector<1x64x16xf32>
    %48 = vector.shape_cast %47 : vector<1x64x16xf32> to vector<64x16xf32>
    %cst_21 = arith.constant dense<0.000000e+00> : vector<64x128xf32>
    %49 = tpu.matmul %48, %34, %cst_21 {dimension_numbers = #tpu.dot_dimension_numbers<[1], [0], [0], [1], [0, 0, 1, 1], [], []>} : vector<64x16xf32>, vector<16x128xf32>, vector<64x128xf32> -> vector<64x128xf32>
    %50 = arith.addf %46, %49 : vector<64x128xf32>
    %c2 = arith.constant 2 : index
    %c0_22 = arith.constant 0 : index
    %c0_23 = arith.constant 0 : index
    %51 = vector.load %arg1[%c2, %c0_22, %c0_23] : memref<4x64x16xf32, #tpu.memory_space<vmem>>, vector<1x64x16xf32>
    %52 = vector.shape_cast %51 : vector<1x64x16xf32> to vector<64x16xf32>
    %cst_24 = arith.constant dense<0.000000e+00> : vector<64x128xf32>
    %53 = tpu.matmul %52, %38, %cst_24 {dimension_numbers = #tpu.dot_dimension_numbers<[1], [0], [0], [1], [0, 0, 1, 1], [], []>} : vector<64x16xf32>, vector<16x128xf32>, vector<64x128xf32> -> vector<64x128xf32>
    %54 = arith.addf %50, %53 : vector<64x128xf32>
    %c3 = arith.constant 3 : index
    %c0_25 = arith.constant 0 : index
    %c0_26 = arith.constant 0 : index
    %55 = vector.load %arg1[%c3, %c0_25, %c0_26] : memref<4x64x16xf32, #tpu.memory_space<vmem>>, vector<1x64x16xf32>
    %56 = vector.shape_cast %55 : vector<1x64x16xf32> to vector<64x16xf32>
    %cst_27 = arith.constant dense<0.000000e+00> : vector<64x128xf32>
    %57 = tpu.matmul %56, %43, %cst_27 {dimension_numbers = #tpu.dot_dimension_numbers<[1], [0], [0], [1], [0, 0, 1, 1], [], []>} : vector<64x16xf32>, vector<16x128xf32>, vector<64x128xf32> -> vector<64x128xf32>
    %58 = arith.addf %54, %57 : vector<64x128xf32>
    %c0_28 = arith.constant 0 : index
    %c0_29 = arith.constant 0 : index
    %59 = vector.load %arg2[%c0_28, %c0_29] : memref<64x1xf32, #tpu.memory_space<vmem>>, vector<64x1xf32>
    %60 = vector.broadcast %59 : vector<64x1xf32> to vector<64x128xf32>
    %61 = arith.addf %58, %60 : vector<64x128xf32>
    %62 = math.tanh %61 : vector<64x128xf32>
    %cst_30 = arith.constant 0.000000e+00 : f32
    %63 = vector.broadcast %cst_30 : f32 to vector<64x128xf32>
    %64 = arith.maximumf %62, %63 : vector<64x128xf32>
    %65 = math.tanh %64 : vector<64x128xf32>
    %c0_31 = arith.constant 0 : index
    %c0_32 = arith.constant 0 : index
    %66 = vector.load %arg5[%c0_31, %c0_32] : memref<64x128xf32, #tpu.memory_space<vmem>>, vector<64x128xf32>
    tpu.vector_store %arg5[%c0_31, %c0_32], %65 {strides = array<i32>} : memref<64x128xf32, #tpu.memory_space<vmem>>, vector<64x128xf32>,
    return
  }
  func.func @transform_0(%arg0: i32) -> (i32, i32, i32) {
    %c0_i32 = arith.constant 0 : i32
    %c0_i32_0 = arith.constant 0 : i32
    %c0_i32_1 = arith.constant 0 : i32
    %c0_i32_2 = arith.constant 0 : i32
    return %c0_i32, %c0_i32_0, %c0_i32_1 : i32, i32, i32
  }
  func.func @transform_1(%arg0: i32) -> (i32, i32) {
    %c0_i32 = arith.constant 0 : i32
    %c0_i32_0 = arith.constant 0 : i32
    %c0_i32_1 = arith.constant 0 : i32
    return %c0_i32, %c0_i32_0 : i32, i32
  }
  func.func @transform_2(%arg0: i32) -> (i32, i32) {
    %c0_i32 = arith.constant 0 : i32
    %c0_i32_0 = arith.constant 0 : i32
    return %c0_i32, %arg0 : i32, i32
  }
  func.func @transform_3(%arg0: i32) -> (i32, i32) {
    %c1_i32 = arith.constant 1 : i32
    %0 = arith.addi %arg0, %c1_i32 : i32
    %c1_i32_0 = arith.constant 1 : i32
    %1 = arith.minsi %0, %c1_i32_0 : i32
    %c0_i32 = arith.constant 0 : i32
    %c0_i32_1 = arith.constant 0 : i32
    return %c0_i32, %1 : i32, i32
  }
  func.func @transform_4(%arg0: i32) -> (i32, i32) {
    %c0_i32 = arith.constant 0 : i32
    %c0_i32_0 = arith.constant 0 : i32
    return %c0_i32, %arg0 : i32, i32
  }
}

</mosaic_0001>

<bundles_post_ra>
// kernel: tile.8
= control target key start
LH: loop header
LB: loop body
LE: loop exit
PB: predicated region body
PF: predicated region fallthrough
CT: control target
= control target key end

     0   :  { %2 = vsyncpa [#allocation1], 0  ;;  %s48_s8 = smov [#allocation0]   ;;  %s65_s0 = inlined_call_operand.hbm [shape: f32[16], index: 0, kind: input, shape index: {}]   ;;  %s66_s1 = inlined_call_operand.vmem [shape: f32[4,16], index: 1, kind: output, shape index: {}]  }
   0x1   :  { %s8_s0 = sshll.u32 %s65_s0, 4  ;;  %s10_s9 = sshll.u32 %s48_s8, 4  ;;  %s9_s0 = int_to_ptr.hbm [resolvable:$true] %s8_s0  ;;  %s11_s9 = int_to_ptr.vmem [resolvable:$true] %s10_s9 }
   0x2   :  { %13 = dma.hbm_to_vmem [thread:$0]  %s9_s0, 16, %s11_s9, [#allocation1]  }
   0x3   :  { %46 = dma.done.wait [#allocation1], 16  }
   0x4   :  { %47 = vsyncadd [#allocation1], 4294967280  ;;  %v18_v0 = vld [vmem:[#allocation0] ss:$0 sm:$0xff] }
   0x5   :  { %19 = vst [vmem:[%s66_s1] sm:$0xf] %v18_v0 }
   0x6   :  { %20 = vsyncpa [#allocation1], 1 }

// kernel: tile.0
= control target key start
LH: loop header
LB: loop body
LE: loop exit
PB: predicated region body
PF: predicated region fallthrough
CT: control target
= control target key end

     0   :  { %s176_s8 = smov 127   ;;  %s177_s9 = smov 123   ;;  %vm7_vm0 = vcmask 7168   ;;  %s331_s0 = inlined_call_operand.vmem [shape: f32[4,16], index: 0, kind: input, shape index: {}]   ;;  %s332_s1 = inlined_call_operand.vmem [shape: f32[64,1], index: 1, kind: output, shape index: {}]  }
   0x1   :  { %v4_v0 = vld [vmem:[%s331_s0] sm:$0xf]  ;;  %s175_s0 = smov 125   ;;  %s178_s10 = smov 124  }
   0x2   :  { %5 = vst [vmem:[#allocation0] sm:$0xf] %v4_v0  ;;  %s179_s11 = smov 126   ;;  %s180_s12 = smov 122  }
   0x3   :  { %s181_s13 = smov 120   ;;  %s182_s14 = smov 121  }
   0x4   :  { %s183_s15 = smov 119   ;;  %s184_s16 = smov 117  }
   0x5   :  { %s185_s17 = smov 118   ;;  %s186_s18 = smov 116  }
   0x6   :  { %s187_s19 = smov 114   ;;  %s188_s20 = smov 115  }
   0x7   :  { %s189_s21 = smov 113  }
   0x9   :  { %v26_v1 = vld [vmem:[#allocation0] sm:$0xf]  }
   0xa   :  { %v10_v2 = vld [vmem:[#allocation0] sm:$0xf]   ;;  %27 = vrot.lane.b32.xlu1 %v26_v1, %s175_s0 }
   0xb   :  { %11 = vrot.lane.b32.xlu0 %v10_v2, %s176_s8  ;;  %v42_v3 = vld [vmem:[#allocation0] sm:$0xf]  }
   0xc   :  { %43 = vrot.lane.b32.xlu2 %v42_v3, %s177_s9  ;;  %v34_v4 = vld [vmem:[#allocation0] sm:$0xf]  }
   0xd   :  { %v18_v5 = vld [vmem:[#allocation0] sm:$0xf]  }
   0xe   :  { %v50_v6 = vld [vmem:[#allocation0] sm:$0xf]  }
   0xf   :  { %v66_v7 = vld [vmem:[#allocation0] sm:$0xf]  }
  0x10   :  { %v58_v8 = vld [vmem:[#allocation0] sm:$0xf]  }
  0x11   :  { %v74_v9 = vld [vmem:[#allocation0] sm:$0xf]  }
  0x12   :  { %35 = vrot.lane.b32.xlu1 %v34_v4, %s178_s10  ;;  %v90_v10 = vld [vmem:[#allocation0] sm:$0xf]  }
  0x13   :  { %19 = vrot.lane.b32.xlu0 %v18_v5, %s179_s11  ;;  %v82_v11 = vld [vmem:[#allocation0] sm:$0xf]  }
  0x14   :  { %51 = vrot.lane.b32.xlu2 %v50_v6, %s180_s12  ;;  %v98_v12 = vld [vmem:[#allocation0] sm:$0xf]  }
  0x15   :  { %v114_v13 = vld [vmem:[#allocation0] sm:$0xf]  }
  0x16   :  { %v106_v14 = vld [vmem:[#allocation0] sm:$0xf]  }
  0x17   :  { %v122_v15 = vld [vmem:[#allocation0] sm:$0xf]  }
  0x18   :  { %v6_v22 = vld [vmem:[#allocation0] sm:$0xf]  }
  0x19   :  { %8 = vst.msk [vmem:[%s332_s1] ss:$16 sm:$0x3] %vm7_vm0, %v6_v22  }
  0x1a   :  { %67 = vrot.lane.b32.xlu1 %v66_v7, %s181_s13  ;;  %9 = vst.msk [vmem:[%s332_s1] ss:$16 sm:$0xc] %vm7_vm0, %v6_v22  }
  0x1b   :  { %59 = vrot.lane.b32.xlu0 %v58_v8, %s182_s14 }
  0x1c   :  { %75 = vrot.lane.b32.xlu2 %v74_v9, %s183_s15 }
  0x22   :  { %91 = vrot.lane.b32.xlu1 %v90_v10, %s184_s16 }
  0x23   :  { %83 = vrot.lane.b32.xlu0 %v82_v11, %s185_s17 }
  0x24   :  { %99 = vrot.lane.b32.xlu2 %v98_v12, %s186_s18 }
  0x2a   :  { %115 = vrot.lane.b32.xlu1 %v114_v13, %s187_s19 }
  0x2b   :  { %107 = vrot.lane.b32.xlu0 %v106_v14, %s188_s20 }
  0x2c   :  { %123 = vrot.lane.b32.xlu2 %v122_v15, %s189_s21 }
  0x66   :  { %v44_v16 = vpop.permute.xlu2 %43  }
  0x67   :  { %138 = vst.msk [vmem:[%s332_s1 + $0x5] ss:$16 sm:$0x3] %vm7_vm0, %v44_v16  }
  0x68   :  { %139 = vst.msk [vmem:[%s332_s1 + $0x5] ss:$16 sm:$0xc] %vm7_vm0, %v44_v16  }
  0x6e   :  { %v52_v17 = vpop.permute.xlu2 %51  }
  0x6f   :  { %140 = vst.msk [vmem:[%s332_s1 + $0x6] ss:$16 sm:$0x3] %vm7_vm0, %v52_v17  }
  0x70   :  { %141 = vst.msk [vmem:[%s332_s1 + $0x6] ss:$16 sm:$0xc] %vm7_vm0, %v52_v17  }
  0x76   :  { %v76_v18 = vpop.permute.xlu2 %75  }
  0x77   :  { %146 = vst.msk [vmem:[%s332_s1 + $0x9] ss:$16 sm:$0x3] %vm7_vm0, %v76_v18  }
  0x78   :  { %147 = vst.msk [vmem:[%s332_s1 + $0x9] ss:$16 sm:$0xc] %vm7_vm0, %v76_v18  }
  0x7c   :  { %v28_v19 = vpop.permute.xlu1 %27  }
  0x7d   :  { %v12_v20 = vpop.permute.xlu0 %11   ;;  %134 = vst.msk [vmem:[%s332_s1 + $0x3] ss:$16 sm:$0x3] %vm7_vm0, %v28_v19  }
  0x7e   :  { %135 = vst.msk [vmem:[%s332_s1 + $0x3] ss:$16 sm:$0xc] %vm7_vm0, %v28_v19   ;;  %v100_v21 = vpop.permute.xlu2 %99  }
  0x7f   :  { %130 = vst.msk [vmem:[%s332_s1 + $0x1] ss:$16 sm:$0x3] %vm7_vm0, %v12_v20  }
  0x80   :  { %131 = vst.msk [vmem:[%s332_s1 + $0x1] ss:$16 sm:$0xc] %vm7_vm0, %v12_v20  }
  0x81   :  { %152 = vst.msk [vmem:[%s332_s1 + $0xc] ss:$16 sm:$0x3] %vm7_vm0, %v100_v21  }
  0x82   :  { %153 = vst.msk [vmem:[%s332_s1 + $0xc] ss:$16 sm:$0xc] %vm7_vm0, %v100_v21  }
  0x84   :  { %v36_v23 = vpop.permute.xlu1 %35  }
  0x85   :  { %v20_v24 = vpop.permute.xlu0 %19   ;;  %136 = vst.msk [vmem:[%s332_s1 + $0x4] ss:$16 sm:$0x3] %vm7_vm0, %v36_v23  }
  0x86   :  { %137 = vst.msk [vmem:[%s332_s1 + $0x4] ss:$16 sm:$0xc] %vm7_vm0, %v36_v23   ;;  %v124_v25 = vpop.permute.xlu2 %123  }
  0x87   :  { %132 = vst.msk [vmem:[%s332_s1 + $0x2] ss:$16 sm:$0x3] %vm7_vm0, %v20_v24  }
  0x88   :  { %133 = vst.msk [vmem:[%s332_s1 + $0x2] ss:$16 sm:$0xc] %vm7_vm0, %v20_v24  }
  0x89   :  { %158 = vst.msk [vmem:[%s332_s1 + $0xf] ss:$16 sm:$0x3] %vm7_vm0, %v124_v25  }
  0x8a   :  { %159 = vst.msk [vmem:[%s332_s1 + $0xf] ss:$16 sm:$0xc] %vm7_vm0, %v124_v25  }
  0x8c   :  { %v68_v26 = vpop.permute.xlu1 %67  }
  0x8d   :  { %v60_v27 = vpop.permute.xlu0 %59   ;;  %144 = vst.msk [vmem:[%s332_s1 + $0x8] ss:$16 sm:$0x3] %vm7_vm0, %v68_v26  }
  0x8e   :  { %145 = vst.msk [vmem:[%s332_s1 + $0x8] ss:$16 sm:$0xc] %vm7_vm0, %v68_v26  }
  0x8f   :  { %142 = vst.msk [vmem:[%s332_s1 + $0x7] ss:$16 sm:$0x3] %vm7_vm0, %v60_v27  }
  0x90   :  { %143 = vst.msk [vmem:[%s332_s1 + $0x7] ss:$16 sm:$0xc] %vm7_vm0, %v60_v27  }
  0x94   :  { %v92_v28 = vpop.permute.xlu1 %91  }
  0x95   :  { %v84_v29 = vpop.permute.xlu0 %83   ;;  %150 = vst.msk [vmem:[%s332_s1 + $0xb] ss:$16 sm:$0x3] %vm7_vm0, %v92_v28  }
  0x96   :  { %151 = vst.msk [vmem:[%s332_s1 + $0xb] ss:$16 sm:$0xc] %vm7_vm0, %v92_v28  }
  0x97   :  { %148 = vst.msk [vmem:[%s332_s1 + $0xa] ss:$16 sm:$0x3] %vm7_vm0, %v84_v29  }
  0x98   :  { %149 = vst.msk [vmem:[%s332_s1 + $0xa] ss:$16 sm:$0xc] %vm7_vm0, %v84_v29  }
  0x9c   :  { %v116_v30 = vpop.permute.xlu1 %115  }
  0x9d   :  { %v108_v31 = vpop.permute.xlu0 %107   ;;  %156 = vst.msk [vmem:[%s332_s1 + $0xe] ss:$16 sm:$0x3] %vm7_vm0, %v116_v30  }
  0x9e   :  { %157 = vst.msk [vmem:[%s332_s1 + $0xe] ss:$16 sm:$0xc] %vm7_vm0, %v116_v30  }
  0x9f   :  { %154 = vst.msk [vmem:[%s332_s1 + $0xd] ss:$16 sm:$0x3] %vm7_vm0, %v108_v31  }
  0xa0   :  { %155 = vst.msk [vmem:[%s332_s1 + $0xd] ss:$16 sm:$0xc] %vm7_vm0, %v108_v31  }

// kernel: model_forward.1
= control target key start
LH: loop header
LB: loop body
LE: loop exit
PB: predicated region body
PF: predicated region fallthrough
CT: control target
= control target key end

     0   :  { %s1161_s15 = smov 0   ;;  %s1163_s16 = smov 0   ;;  %s1467_s0 = inlined_call_operand.vmem [shape: f32[4,64,16], index: 0, kind: input, shape index: {}]   ;;  %s1468_s1 = inlined_call_operand.vmem [shape: f32[64,1], index: 1, kind: input, shape index: {}]   ;;  %s1469_s2 = inlined_call_operand.vmem [shape: f32[16,256], index: 2, kind: input, shape index: {}, may-alias: {2,3}]   ;;  %s1470_s3 = inlined_call_operand.vmem [shape: f32[16,256], index: 3, kind: input, shape index: {}, may-alias: {2,3}]   ;;  %s1471_s4 = inlined_call_operand.vmem [shape: f32[64,256], index: 4, kind: output, shape index: {}]  }
   0x1   :  { %s1165_s17 = smov 0   ;;  %s1167_s18 = smov 0  }
   0x2   :  { %s1169_s19 = smov 0  }
   0x3 LB: > { %s1187_s20 = sadd.s32 4294967295, %s1130_s19   ;;  %s1190_s21 = sadd.s32 1, %s1130_s19   ;;  %s1130_s19 = sphi %s1169_s19, %s1483_s19   ;;  %s1126_s18 = sphi %s1167_s18, %s1482_s18   ;;  %s1122_s17 = sphi %s1165_s17, %s1481_s17   ;;  %s1118_s16 = sphi %s1163_s16, %s1480_s16   ;;  %s1114_s15 = sphi %s1161_s15, %s1479_s15  }
   0x4   : > { %s60_s22 = ssub.s32 %s1130_s19, %s1190_s21  ;;  %s63_s23 = sadd.s32 1, %s1126_s18 }
   0x5   : > { %p61_p0 = scmp.eq.s32.totalorder %s60_s22, 0  ;;  %p70_p1 = scmp.ne.s32.totalorder %s1126_s18, %s1122_s17 }
   0x6   : > { %p71_p2 = scmp.eq.s32.totalorder %s1130_s19, 0  ;;  %p87_p3 = scmp.lt.s32.totalorder %s1190_s21, 1 }
   0x7   : > { %s1200_s24 = scalar_select %p61_p0, %s1126_s18, %s63_s23  }
   0x8   : > { %p1202_p4 = por %p71_p2, %p70_p1  ;;  %s89_s26 = sadd.s32 1, %s1190_s21 }
   0x9   : > { %s1208_s27 = scalar_select %p87_p3, %s1190_s21, 1 }
   0xa   : > { %p90_p5 = scmp.lt.s32.totalorder %s89_s26, 1  ;;  %p102_p6 = scmp.ne.s32.totalorder %s1118_s16, %s1114_s15 }
   0xb   : > { %p132_p7 = scmp.eq.s32.totalorder %s1187_s20, 1  ;;  %s95_s5 = sadd.s32 1, %s1118_s16 }
   0xc   : > { %s1485_s26 = smov (!%p90_p5, %s89_s26), 1  ;;  %p1213_p8 = por %p102_p6, %p71_p2 }
   0xd   : > { %p1217_p9 = por %p132_p7, %p70_p1  ;;  %s92_s30 = ssub.s32 %s1208_s27, %s1485_s26 }
   0xe   : > { %p93_p10 = scmp.eq.s32.totalorder %s92_s30, 0  ;;  %p937_p11 = scmp.ge.s32.totalorder %s1130_s19, 2 }
  0x10   : > { %s1224_s6 = scalar_select %p93_p10, %s1118_s16, %s95_s5  }
  0x11   : > { %160 = sbr.rel (%p937_p11) target bundleno = 34 (0x22), region = 24 }
  0x16   : > { %163 = sbr.rel (!%p1202_p4) target bundleno = 28 (0x1c), region = 28  ;;  %s165_s7 = sand.u32 (%p1202_p4), 1, %s1126_s18  }
  0x17   : > { %s939_s8 = sshll.u32 (%p1202_p4), %s1130_s19, 3  ;;  %s938_s9 = sshll.u32 (%p1202_p4), %s165_s7, 4 }
  0x18   : > { %s169_s12 = scalar_lea.vmem (%p1202_p4), %s1469_s2, %s939_s8  ;;  %s167_s13 = scalar_lea.vmem (%p1202_p4), [#allocation3], %s938_s9 }
  0x19   : > { %v200_v0 = vld [vmem:[%s169_s12] sm:$0xff] (%p1202_p4)  ;;  %v202_v1 = vld [vmem:[%s169_s12 + $0x10] sm:$0xff] (%p1202_p4) }
  0x1a   : > { %201 = vst [vmem:[%s167_s13] sm:$0xff] (%p1202_p4), %v200_v0 }
  0x1b   : > { %203 = vst [vmem:[%s167_s13 + $0x8] sm:$0xff] %v202_v1 }
  0x1c PF: > { %209 = sbr.rel (!%p1213_p8) target bundleno = 34 (0x22), region = 66  ;;  %s211_s14 = sand.u32 (%p1213_p8), 1, %s1118_s16  }
  0x1d   : > { %s941_s22 = sshll.u32 (%p1213_p8), %s1208_s27, 3  ;;  %s940_s23 = sshll.u32 (%p1213_p8), %s211_s14, 4 }
  0x1e   : > { %s218_s30 = scalar_lea.vmem (%p1213_p8), %s1470_s3, %s941_s22  ;;  %s213_s5 = scalar_lea.vmem (%p1213_p8), [#allocation4], %s940_s23 }
  0x1f   : > { %v249_v2 = vld [vmem:[%s218_s30] sm:$0xff] (%p1213_p8)  ;;  %v251_v3 = vld [vmem:[%s218_s30 + $0x10] sm:$0xff] (%p1213_p8) }
  0x20   : > { %250 = vst [vmem:[%s213_s5] sm:$0xff] (%p1213_p8), %v249_v2 }
  0x21   : > { %252 = vst [vmem:[%s213_s5 + $0x8] sm:$0xff] %v251_v3 }
  0x22 PF: > { %p942_p12 = scmp.ge.s32.totalorder %s1130_s19, 1  ;;  %p257_p13 = scmp.lt.s32.totalorder %s1130_s19, 3 }
  0x24   : > { %p258_p0 = pnand %p942_p12, %p257_p13 }
  0x25   : > { %s264_s27 = sand.u32 (!%p258_p0), 1, %s1122_s17   ;;  %s271_s7 = sand.u32 (!%p258_p0), 1, %s1114_s15  }
  0x26   : > { %261 = sbr.rel (%p258_p0) target bundleno = 403 (0x193), region = 104  ;;  %s943_s28 = sshll.u32 (!%p258_p0), %s264_s27, 4 }
  0x27   : > { %s944_s8 = sshll.u32 (!%p258_p0), %s271_s7, 4  ;;  %s266_s9 = scalar_lea.vmem (!%p258_p0), [#allocation3], %s943_s28 }
  0x28   : > { %s1132_s10 = smov (!%p258_p0), 112   ;;  %s273_s11 = scalar_lea.vmem (!%p258_p0), [#allocation4], %s944_s8 }
  0x29   : > { %s1133_s19 = smov (!%p258_p0), 111   ;;  %s1134_s15 = smov (!%p258_p0), 127  }
  0x2a   : > { %s946_s12 = sshll.u32 (!%p258_p0), %s1187_s20, 7 }
  0x2b   : > { %v303_v4 = vld [vmem:[%s266_s9 + $0x8] sm:$0xff]  ;;  %v302_v5 = vld [vmem:[%s266_s9] sm:$0xff]  ;;  %vm308_vm0 = vcmask 138240   ;;  %v315_v10 = vlaneseq  ;;  %v318_v12 = vstv %s946_s12  ;;  %vm383_vm3 = vcmask 908288   ;;  %s1010_s17 = sshll.u32 (%p1217_p9), %s1187_s20, 3 }
  0x2c   : > { %361 = vrot.lane.b32.xlu0 %v303_v4, %s1132_s10  ;;  %357 = vrot.lane.b32.xlu1 %v302_v5, %s1132_s10  ;;  %v307_v6 = vld [vmem:[%s273_s11 + $0x8] sm:$0xff]  ;;  %v306_v7 = vld [vmem:[%s273_s11] sm:$0xff]  ;;  %vm407_vm5 = vcmask 130048   ;;  %vm365_vm6 = vcmask 916480   ;;  %v1135_v29 = vmov 0   ;;  %vm348_vm7 = vcmask 1039360  }
  0x2d   : > { %379 = vrot.lane.b32.xlu2 %v303_v4, %s1133_s19  ;;  %511 = vmatpush.msra.mxu1 %v303_v4  ;;  %310 = vst.msk [vmem:[#allocation2 + $0x18] sm:$0xff] %vm308_vm0, %v307_v6  ;;  %v316_v11 = vand.u32 127, %v315_v10  ;;  %v390_v20 = vld [vmem:[%s1467_s0] sm:$0xff]  ;;  %v391_v23 = vld [vmem:[%s1467_s0 + $0x8] sm:$0xff]  ;;  %v392_v30 = vld [vmem:[%s1467_s0 + $0x10] sm:$0xff] }
  0x2e   : > { %309 = vst.msk [vmem:[#allocation2 + $0x8] sm:$0xff] %vm308_vm0, %v306_v7  ;;  %v973_v27 = vld [vmem:[%s1467_s0 + $0x80] sm:$0xff]  ;;  %1057 = vset.pattern.permute.xlu0 %v1135_v29  ;;  %1058 = vset.pattern.permute.xlu1 %v1135_v29  ;;  %v974_v36 = vld [vmem:[%s1467_s0 + $0x88] sm:$0xff]  ;;  %v393_v37 = vld [vmem:[%s1467_s0 + $0x18] sm:$0xff] }
  0x2f   : > { %512 = vmatpush.msra.mxu1 %v302_v5  ;;  %v319_v14 = vadd.s32 %v318_v12, %v316_v11  ;;  %v324_v15 = vand.u32 15, %v316_v11  ;;  %v702_v31 = vld [vmem:[%s1468_s1] sm:$0xff]  ;;  %1059 = vset.pattern.permute.xlu2 %v1135_v29  ;;  %v703_v38 = vld [vmem:[%s1468_s1 + $0x8] sm:$0xff]  ;;  %v975_v46 = vld [vmem:[%s1467_s0 + $0x90] sm:$0xff] }
  0x30   : > { %965 = vmatmul.msk.f32.vlgmr.msra.gmra.mxu1 %vm407_vm5, %v390_v20  ;;  %v991_v41 = vld [vmem:[%s1467_s0 + $0xc0] sm:$0xff]  ;;  %v992_v48 = vld [vmem:[%s1467_s0 + $0xc8] sm:$0xff]  ;;  %v976_v50 = vld [vmem:[%s1467_s0 + $0x98] sm:$0xff] }
  0x31   : > { %vm1248_vm1 = vcmp.ne.s32.totalorder %v324_v15, 15  ;;  %vm333_vm2 = vcmp.lt.s32.totalorder %v319_v14, 240  ;;  %v947_v44 = vld [vmem:[%s1467_s0 + $0x40] sm:$0xff]  ;;  %v948_v49 = vld [vmem:[%s1467_s0 + $0x48] sm:$0xff]  ;;  %v705_v52 = vld [vmem:[%s1468_s1 + $0x18] sm:$0xff] }
  0x32   : > { %vm1255_vm4 = vmand %vm1248_vm1, %vm333_vm2  ;;  %v394_v47 = vld [vmem:[%s1467_s0 + $0x20] sm:$0xff]  ;;  %v395_v51 = vld [vmem:[%s1467_s0 + $0x28] sm:$0xff] }
  0x33   : > { %v993_v53 = vld [vmem:[%s1467_s0 + $0xd0] sm:$0xff]  ;;  %v977_v55 = vld [vmem:[%s1467_s0 + $0xa0] sm:$0xff]  ;;  %v994_v57 = vld [vmem:[%s1467_s0 + $0xd8] sm:$0xff] }
  0x34   : > { %v314_v8 = vld [vmem:[#allocation2 + $0x18] sm:$0xff]  ;;  %v949_v54 = vld [vmem:[%s1467_s0 + $0x50] sm:$0xff]  ;;  %v978_v59 = vld [vmem:[%s1467_s0 + $0xa8] sm:$0xff] }
  0x35   : > { %363 = vrot.lane.b32.xlu0 %v314_v8, %s1132_s10  ;;  %v312_v9 = vld [vmem:[#allocation2 + $0x8] sm:$0xff]  ;;  %381 = vrot.lane.b32.xlu2 %v314_v8, %s1133_s19  ;;  %v396_v56 = vld [vmem:[%s1467_s0 + $0x30] sm:$0xff]  ;;  %v950_v58 = vld [vmem:[%s1467_s0 + $0x58] sm:$0xff] }
  0x36   : > { %359 = vrot.lane.b32.xlu1 %v312_v9, %s1132_s10  ;;  %v397_v60 = vld [vmem:[%s1467_s0 + $0x38] sm:$0xff]  ;;  %v707_v61 = vld [vmem:[%s1468_s1 + $0x28] sm:$0xff]  ;;  %v704_v62 = vld [vmem:[%s1468_s1 + $0x10] sm:$0xff]  ;;  %s945_s10 = sshll.u32 %s264_s27, 6 }
  0x37   : > { %v708_v63 = vld [vmem:[%s1468_s1 + $0x30] sm:$0xff]  ;;  %v995_v0 = vld [vmem:[%s1467_s0 + $0xe0] sm:$0xff]  ;;  %v980_v6 = vld [vmem:[%s1467_s0 + $0xb8] sm:$0xff]  ;;  %s1427_s11 = scalar_lea.vmem [#allocation5], %s945_s10 }
  0x38   : > { %966 = vmatmul.msk.f32.gmra.mxu1 %vm407_vm5, %v391_v23  ;;  %v951_v1 = vld [vmem:[%s1467_s0 + $0x60] sm:$0xff]  ;;  %v979_v2 = vld [vmem:[%s1467_s0 + $0xb0] sm:$0xff]  ;;  %v709_v7 = vld [vmem:[%s1468_s1 + $0x38] sm:$0xff] }
  0x39   : > { %v706_v3 = vld [vmem:[%s1468_s1 + $0x20] sm:$0xff]  ;;  %v998_v10 = vld [vmem:[%s1467_s0 + $0xf8] sm:$0xff] }
  0x3a   : > { %v954_v11 = vld [vmem:[%s1467_s0 + $0x78] sm:$0xff] }
  0x3d   : > { %344 = vrot.lane.b32.xlu0 %v303_v4, %s1134_s15  ;;  %375 = vrot.lane.b32.xlu2 %v302_v5, %s1133_s19  ;;  %v996_v4 = vld [vmem:[%s1467_s0 + $0xe8] sm:$0xff] }
  0x3e   : > { %346 = vrot.lane.b32.xlu1 %v314_v8, %s1134_s15  ;;  %v997_v8 = vld [vmem:[%s1467_s0 + $0xf0] sm:$0xff] }
  0x40   : > { %967 = vmatmul.msk.f32.gmra.mxu1 %vm407_vm5, %v392_v30 }
  0x45   : > { %377 = vrot.lane.b32.xlu0 %v312_v9, %s1133_s19  ;;  %342 = vrot.lane.b32.xlu2 %v312_v9, %s1134_s15  ;;  %v953_v9 = vld [vmem:[%s1467_s0 + $0x70] sm:$0xff] }
  0x46   : > { %340 = vrot.lane.b32.xlu1 %v302_v5, %s1134_s15  ;;  %v952_v5 = vld [vmem:[%s1467_s0 + $0x68] sm:$0xff]  ;;  %s798_s15 = scalar_lea.vmem (%p1217_p9), %s1471_s4, %s1010_s17 }
  0x48   : > { %968 = vmatmul.msk.f32.gmra.mxu1 %vm407_vm5, %v393_v37 }
  0x4d   : > { %712 = vperm.xlu0 %1057, %v702_v31   ;;  %722 = vperm.xlu2 %1059, %v704_v62  }
  0x4e   : > { %717 = vperm.xlu1 %1058, %v703_v38  }
  0x50   : > { %969 = vmatmul.msk.f32.gmra.mxu1 %vm407_vm5, %v394_v47 }
  0x55   : > { %737 = vperm.xlu0 %1057, %v707_v61   ;;  %732 = vperm.xlu2 %1059, %v706_v3  }
  0x56   : > { %727 = vperm.xlu1 %1058, %v705_v52  }
  0x58   : > { %970 = vmatmul.msk.f32.gmra.mxu1 %vm407_vm5, %v395_v51 }
  0x5d   : > { %747 = vperm.xlu2 %1059, %v709_v7  }
  0x5e   : > { %742 = vperm.xlu1 %1058, %v708_v63  }
  0x60   : > { %971 = vmatmul.msk.f32.gmra.mxu1 %vm407_vm5, %v396_v56 }
  0x68   : > { %972 = vmatmul.msk.f32.gmra.mxu1 %vm407_vm5, %v397_v60 }
  0x87   : > { %v380_v13 = vpop.permute.xlu2 %379 }
  0x8f   : > { %v382_v18 = vpop.permute.xlu2 %381 }
  0x90   : > { %v385_v19 = vsel %vm383_vm3, %v380_v13, %v382_v18 }
  0x91   : > { %999 = vmatpush.msk.msra.mxu3 %vm1255_vm4, %v385_v19 }
  0x97   : > { %v376_v32 = vpop.permute.xlu2 %375 }
  0x9e   : > { %v362_v21 = vpop.permute.xlu0 %361  ;;  %v358_v22 = vpop.permute.xlu1 %357 }
  0x9f   : > { %v343_v39 = vpop.permute.xlu2 %342 }
  0xa7   : > { %v364_v24 = vpop.permute.xlu0 %363 }
  0xa8   : > { %v360_v25 = vpop.permute.xlu1 %359  ;;  %v367_v26 = vsel %vm365_vm6, %v362_v21, %v364_v24 }
  0xa9   : > { %981 = vmatpush.msk.msra.mxu2 %vm333_vm2, %v367_v26  ;;  %v366_v28 = vsel %vm365_vm6, %v358_v22, %v360_v25 }
  0xab   : > { %982 = vmatpush.msk.msra.mxu2 %vm333_vm2, %v366_v28 }
  0xac   : > { %983 = vmatmul.msk.f32.vlgmr.msra.gmra.mxu2 %vm407_vm5, %v973_v27 }
  0xad   : > { %v514_v12 = vpop.f32.mrf.mxu1 }
  0xaf   : > { %v345_v33 = vpop.permute.xlu0 %344 }
  0xb0   : > { %v347_v34 = vpop.permute.xlu1 %346 }
  0xb1   : > { %v350_v35 = vsel %vm348_vm7, %v345_v33, %v347_v34 }
  0xb2   : > { %955 = vmatpush.msk.msra.mxu0 %vm1248_vm1, %v350_v35 }
  0xb4   : > { %984 = vmatmul.msk.f32.gmra.mxu2 %vm407_vm5, %v974_v36 }
  0xb5   : > { %v517_v14 = vpop.f32.mrf.mxu1 }
  0xb7   : > { %v378_v40 = vpop.permute.xlu0 %377 }
  0xb8   : > { %v384_v42 = vsel %vm383_vm3, %v376_v32, %v378_v40  ;;  %v341_v43 = vpop.permute.xlu1 %340  ;;  %v723_v40 = vpop.permute.xlu2 %722 }
  0xb9   : > { %1000 = vmatpush.msk.msra.mxu3 %vm1255_vm4, %v384_v42  ;;  %v349_v45 = vsel %vm348_vm7, %v341_v43, %v343_v39 }
  0xba   : > { %1001 = vmatmul.msk.f32.vlgmr.msra.gmra.mxu3 %vm407_vm5, %v991_v41  ;;  %956 = vmatpush.msk.msra.mxu0 %vm1248_vm1, %v349_v45 }
  0xbb   : > { %957 = vmatmul.msk.f32.vlgmr.msra.gmra.mxu0 %vm407_vm5, %v947_v44 }
  0xbc   : > { %985 = vmatmul.msk.f32.gmra.mxu2 %vm407_vm5, %v975_v46 }
  0xbd   : > { %v520_v19 = vpop.f32.mrf.mxu1 }
  0xbf   : > { %v713_v21 = vpop.permute.xlu0 %712 }
  0xc0   : > { %v718_v29 = vpop.permute.xlu1 %717 }
  0xc2   : > { %1002 = vmatmul.msk.f32.gmra.mxu3 %vm407_vm5, %v992_v48 }
  0xc3   : > { %958 = vmatmul.msk.f32.gmra.mxu0 %vm407_vm5, %v948_v49 }
  0xc4   : > { %986 = vmatmul.msk.f32.gmra.mxu2 %vm407_vm5, %v976_v50 }
  0xc5   : > { %v523_v31 = vpop.f32.mrf.mxu1 }
  0xc8   : > { %v728_v52 = vpop.permute.xlu1 %727 }
  0xca   : > { %1003 = vmatmul.msk.f32.gmra.mxu3 %vm407_vm5, %v993_v53 }
  0xcb   : > { %959 = vmatmul.msk.f32.gmra.mxu0 %vm407_vm5, %v949_v54 }
  0xcc   : > { %987 = vmatmul.msk.f32.gmra.mxu2 %vm407_vm5, %v977_v55 }
  0xcd   : > { %v526_v45 = vpop.f32.mrf.mxu1 }
  0xd2   : > { %1004 = vmatmul.msk.f32.gmra.mxu3 %vm407_vm5, %v994_v57 }
  0xd3   : > { %960 = vmatmul.msk.f32.gmra.mxu0 %vm407_vm5, %v950_v58 }
  0xd4   : > { %988 = vmatmul.msk.f32.gmra.mxu2 %vm407_vm5, %v978_v59 }
  0xd5   : > { %v529_v60 = vpop.f32.mrf.mxu1 }
  0xda   : > { %1005 = vmatmul.msk.f32.gmra.mxu3 %vm407_vm5, %v995_v0  ;;  %v733_v0 = vpop.permute.xlu2 %732 }
  0xdb   : > { %961 = vmatmul.msk.f32.gmra.mxu0 %vm407_vm5, %v951_v1 }
  0xdc   : > { %989 = vmatmul.msk.f32.gmra.mxu2 %vm407_vm5, %v979_v2 }
  0xe2   : > { %1006 = vmatmul.msk.f32.gmra.mxu3 %vm407_vm5, %v996_v4 }
  0xe3   : > { %962 = vmatmul.msk.f32.gmra.mxu0 %vm407_vm5, %v952_v5 }
  0xe4   : > { %990 = vmatmul.msk.f32.gmra.mxu2 %vm407_vm5, %v980_v6 }
  0xea   : > { %1007 = vmatmul.msk.f32.gmra.mxu3 %vm407_vm5, %v997_v8 }
  0xeb   : > { %963 = vmatmul.msk.f32.gmra.mxu0 %vm407_vm5, %v953_v9  ;;  %v532_v9 = vpop.f32.mrf.mxu1 }
  0xf2   : > { %1008 = vmatmul.msk.f32.gmra.mxu3 %vm407_vm5, %v998_v10 }
  0xf3   : > { %964 = vmatmul.msk.f32.gmra.mxu0 %vm407_vm5, %v954_v11  ;;  %v738_v11 = vpop.permute.xlu0 %737 }
 0x12f   : > { %v588_v13 = vpop.f32.mrf.mxu2 }
 0x137   : > { %v591_v15 = vpop.f32.mrf.mxu2 }
 0x138   : > { %v449_v16 = vpop.f32.mrf.mxu0 }
 0x139   : > { %v515_v17 = vadd.f32 %v514_v12, %v449_v16 }
 0x13b   : > { %v612_v18 = vadd.f32 %v588_v13, %v515_v17 }
 0x13d   : > { %v670_v20 = vpop.f32.mrf.mxu3 }
 0x13e   : > { %v694_v22 = vadd.f32 %v670_v20, %v612_v18 }
 0x13f   : > { %v594_v23 = vpop.f32.mrf.mxu2 }
 0x140   : > { %v750_v24 = vadd.f32 %v713_v21, %v694_v22  ;;  %v452_v25 = vpop.f32.mrf.mxu0 }
 0x141   : > { %v518_v26 = vadd.f32 %v517_v14, %v452_v25 }
 0x142   : > { %1060 = vtanh.f32 %v750_v24  ;;  %v743_v24 = vpop.permute.xlu1 %742 }
 0x143   : > { %v613_v27 = vadd.f32 %v591_v15, %v518_v26 }
 0x145   : > { %v673_v28 = vpop.f32.mrf.mxu3 }
 0x146   : > { %v695_v30 = vadd.f32 %v673_v28, %v613_v27 }
 0x147   : > { %v597_v35 = vpop.f32.mrf.mxu2 }
 0x148   : > { %v1061_v32 = vpop.eup %1060  ;;  %v751_v33 = vadd.f32 %v718_v29, %v695_v30  ;;  %v455_v34 = vpop.f32.mrf.mxu0 }
 0x149   : > { %v766_v36 = vmax.f32 %v1061_v32, 0.0  ;;  %v521_v37 = vadd.f32 %v520_v19, %v455_v34 }
 0x14a   : > { %1062 = vtanh.f32 %v751_v33 }
 0x14b   : > { %1064 = vtanh.f32 %v766_v36  ;;  %v614_v38 = vadd.f32 %v594_v23, %v521_v37  ;;  %v535_v23 = vpop.f32.mrf.mxu1 }
 0x14d   : > { %v676_v39 = vpop.f32.mrf.mxu3 }
 0x14e   : > { %v696_v41 = vadd.f32 %v676_v39, %v614_v38 }
 0x14f   : > { %v600_v49 = vpop.f32.mrf.mxu2 }
 0x150   : > { %v1063_v42 = vpop.eup %1062  ;;  %v752_v43 = vadd.f32 %v723_v40, %v696_v41  ;;  %v458_v44 = vpop.f32.mrf.mxu0 }
 0x151   : > { %v1065_v46 = vpop.eup %1064  ;;  %v767_v47 = vmax.f32 %v1063_v42, 0.0  ;;  %v524_v48 = vadd.f32 %v523_v31, %v458_v44 }
 0x152   : > { %782 = vst [vmem:[%s1427_s11] sm:$0xff] %v1065_v46  ;;  %1066 = vtanh.f32 %v752_v43 }
 0x153   : > { %1068 = vtanh.f32 %v767_v47  ;;  %v615_v50 = vadd.f32 %v597_v35, %v524_v48  ;;  %v748_v35 = vpop.permute.xlu2 %747 }
 0x155   : > { %v679_v51 = vpop.f32.mrf.mxu3 }
 0x156   : > { %v697_v53 = vadd.f32 %v679_v51, %v615_v50 }
 0x157   : > { %v603_v62 = vpop.f32.mrf.mxu2 }
 0x158   : > { %v1067_v54 = vpop.eup %1066  ;;  %v753_v55 = vadd.f32 %v728_v52, %v697_v53  ;;  %v461_v56 = vpop.f32.mrf.mxu0 }
 0x159   : > { %v1069_v57 = vpop.eup %1068  ;;  %v768_v58 = vmax.f32 %v1067_v54, 0.0  ;;  %v527_v59 = vadd.f32 %v526_v45, %v461_v56  ;;  %v841_v44 = vld [vmem:[%s1427_s11] sm:$0xff] (%p1217_p9) }
 0x15a   : > { %783 = vst [vmem:[%s1427_s11 + $0x8] sm:$0xff] %v1069_v57  ;;  %1070 = vtanh.f32 %v753_v55 }
 0x15b   : > { %1072 = vtanh.f32 %v768_v58  ;;  %v616_v61 = vadd.f32 %v600_v49, %v527_v59  ;;  %842 = vst [vmem:[%s798_s15] sm:$0xff] (%p1217_p9), %v841_v44 }
 0x15d   : > { %v682_v63 = vpop.f32.mrf.mxu3 }
 0x15e   : > { %v698_v1 = vadd.f32 %v682_v63, %v616_v61 }
 0x15f   : > { %v606_v13 = vpop.f32.mrf.mxu2 }
 0x160   : > { %v1071_v2 = vpop.eup %1070  ;;  %v754_v3 = vadd.f32 %v733_v0, %v698_v1  ;;  %v464_v4 = vpop.f32.mrf.mxu0 }
 0x161   : > { %v1073_v5 = vpop.eup %1072  ;;  %v769_v6 = vmax.f32 %v1071_v2, 0.0  ;;  %v530_v7 = vadd.f32 %v529_v60, %v464_v4  ;;  %v843_v45 = vld [vmem:[%s1427_s11 + $0x8] sm:$0xff] (%p1217_p9) }
 0x162   : > { %784 = vst [vmem:[%s1427_s11 + $0x10] sm:$0xff] %v1073_v5  ;;  %1074 = vtanh.f32 %v754_v3 }
 0x163   : > { %1076 = vtanh.f32 %v769_v6  ;;  %v617_v8 = vadd.f32 %v603_v62, %v530_v7  ;;  %844 = vst [vmem:[%s798_s15 + $0x10] sm:$0xff] (%p1217_p9), %v843_v45 }
 0x165   : > { %v685_v10 = vpop.f32.mrf.mxu3 }
 0x166   : > { %v699_v12 = vadd.f32 %v685_v10, %v617_v8 }
 0x167   : > { %v609_v28 = vpop.f32.mrf.mxu2 }
 0x168   : > { %v1075_v14 = vpop.eup %1074  ;;  %v755_v15 = vadd.f32 %v738_v11, %v699_v12  ;;  %v467_v16 = vpop.f32.mrf.mxu0 }
 0x169   : > { %v1077_v17 = vpop.eup %1076  ;;  %v770_v18 = vmax.f32 %v1075_v14, 0.0  ;;  %v533_v19 = vadd.f32 %v532_v9, %v467_v16  ;;  %v845_v46 = vld [vmem:[%s1427_s11 + $0x10] sm:$0xff] (%p1217_p9) }
 0x16a   : > { %785 = vst [vmem:[%s1427_s11 + $0x18] sm:$0xff] %v1077_v17  ;;  %1078 = vtanh.f32 %v755_v15 }
 0x16b   : > { %1080 = vtanh.f32 %v770_v18  ;;  %v618_v20 = vadd.f32 %v606_v13, %v533_v19  ;;  %846 = vst [vmem:[%s798_s15 + $0x20] sm:$0xff] (%p1217_p9), %v845_v46 }
 0x16d   : > { %v688_v21 = vpop.f32.mrf.mxu3 }
 0x16e   : > { %v700_v22 = vadd.f32 %v688_v21, %v618_v20 }
 0x170   : > { %v1079_v25 = vpop.eup %1078  ;;  %v756_v26 = vadd.f32 %v743_v24, %v700_v22  ;;  %v470_v27 = vpop.f32.mrf.mxu0 }
 0x171   : > { %v1081_v29 = vpop.eup %1080  ;;  %v771_v30 = vmax.f32 %v1079_v25, 0.0  ;;  %v536_v31 = vadd.f32 %v535_v23, %v470_v27  ;;  %v847_v47 = vld [vmem:[%s1427_s11 + $0x18] sm:$0xff] (%p1217_p9) }
 0x172   : > { %786 = vst [vmem:[%s1427_s11 + $0x20] sm:$0xff] %v1081_v29  ;;  %1082 = vtanh.f32 %v756_v26 }
 0x173   : > { %1084 = vtanh.f32 %v771_v30  ;;  %v619_v32 = vadd.f32 %v609_v28, %v536_v31  ;;  %848 = vst [vmem:[%s798_s15 + $0x30] sm:$0xff] (%p1217_p9), %v847_v47 }
 0x175   : > { %v691_v33 = vpop.f32.mrf.mxu3 }
 0x176   : > { %v701_v34 = vadd.f32 %v691_v33, %v619_v32 }
 0x178   : > { %v1083_v36 = vpop.eup %1082  ;;  %v757_v37 = vadd.f32 %v748_v35, %v701_v34 }
 0x179   : > { %v1085_v38 = vpop.eup %1084  ;;  %v772_v39 = vmax.f32 %v1083_v36, 0.0  ;;  %v849_v48 = vld [vmem:[%s1427_s11 + $0x20] sm:$0xff] (%p1217_p9) }
 0x17a   : > { %787 = vst [vmem:[%s1427_s11 + $0x28] sm:$0xff] %v1085_v38  ;;  %1086 = vtanh.f32 %v757_v37 }
 0x17b   : > { %1088 = vtanh.f32 %v772_v39  ;;  %850 = vst [vmem:[%s798_s15 + $0x40] sm:$0xff] (%p1217_p9), %v849_v48 }
 0x180   : > { %v1087_v40 = vpop.eup %1086 }
 0x181   : > { %v1089_v41 = vpop.eup %1088  ;;  %v773_v42 = vmax.f32 %v1087_v40, 0.0  ;;  %v851_v49 = vld [vmem:[%s1427_s11 + $0x28] sm:$0xff] (%p1217_p9) }
 0x182   : > { %788 = vst [vmem:[%s1427_s11 + $0x30] sm:$0xff] %v1089_v41 }
 0x183   : > { %1090 = vtanh.f32 %v773_v42  ;;  %852 = vst [vmem:[%s798_s15 + $0x50] sm:$0xff] (%p1217_p9), %v851_v49 }
 0x186   : > { %796 = sbr.rel (!%p1217_p9) target bundleno = 403 (0x193), region = 116 }
 0x189   : > { %v1091_v43 = vpop.eup %1090  ;;  %v853_v50 = vld [vmem:[%s1427_s11 + $0x30] sm:$0xff] (%p1217_p9) }
 0x18a   : > { %789 = vst [vmem:[%s1427_s11 + $0x38] sm:$0xff] %v1091_v43 }
 0x18b   : > { %854 = vst [vmem:[%s798_s15 + $0x60] sm:$0xff] %v853_v50 }
 0x191   : > { %v855_v51 = vld [vmem:[%s1427_s11 + $0x38] sm:$0xff] }
 0x192   : > { %856 = vst [vmem:[%s798_s15 + $0x70] sm:$0xff] %v855_v51 }
 0x193 PF: > { %p11_p1 = scmp.ge.s32.totalorder %s1190_s21, 4   ;;  %s1479_s15 = smov %s1118_s16 }
 0x194   : > { %s1480_s16 = smov %s1224_s6  ;;  %s1481_s17 = smov %s1126_s18 }
 0x195   : > { %s1482_s18 = smov %s1200_s24  ;;  %s1483_s19 = smov %s1190_s21 }
 0x196   :  { %13 = sbr.rel (!%p11_p1) target bundleno = 3 (0x3), region = 196 }

</bundles_post_ra>
